<compile_context>
chip_gen: v6e
topology: v6e:2x2x1
jax: 0.10.0
libtpu: 0.0.40
codegen_flags: <defaults>
</compile_context>

<pallas_src>
import numpy as np
import jax
import jax.numpy as jnp
from jax.experimental import pallas as pl
from jax.experimental.pallas import tpu as pltpu


def _round_up(x: int, m: int) -> int:
    return (x + m - 1) // m * m


def _make_avg_matrix(in_steps: int, kernel_size: int) -> np.ndarray:
    """(T, T) matrix A with mean = x @ A (replicate padding, stride 1). Vectorized."""
    pad = (kernel_size - 1) // 2
    # source time index feeding output column t at window offset j, edge-clamped
    src = np.clip(
        np.arange(in_steps)[:, None] + np.arange(-pad, pad + 1)[None, :],
        0, in_steps - 1)                                      # (T, k)
    cols = np.repeat(np.arange(in_steps), kernel_size)        # (T*k,)
    A = np.zeros((in_steps, in_steps), dtype=np.float32)
    np.add.at(A, (src.ravel(), cols), 1.0 / kernel_size)
    return A


def _dlinear_fused_kernel(x_ref, w_ref, b_ref, out_ref):
    # x_ref  : (NBLK, BDp, T)   row slabs for NBLK nodes
    # w_ref  : (NBLK, T,  Op)   folded weights W_eff = Ws + A @ (Wt - Ws), O padded
    # b_ref  : (NBLK, 1,  Op)   merged bias bs + bt, O padded
    # out_ref: (NBLK, BDp, Op)
    acc = jnp.einsum("nrt,nto->nro", x_ref[...], w_ref[...],
                     preferred_element_type=jnp.float32)
    out_ref[...] = (acc + b_ref[...]).astype(out_ref.dtype)


def dlinear_temporal_pallas(x, ws, bs, wt, bt, kernel_size,
                            compute_dtype=jnp.float32):
    """x: (B, T, N, D) f32.  ws/wt: (N, T, O).  bs/bt: (N, 1, O).  Returns (B, O, N, D)."""
    B, T, N, D = x.shape
    O = ws.shape[-1]
    BD = B * D

    # ---- one-time weight fold (f32) -------------------------------------------------
    avg = jnp.asarray(_make_avg_matrix(T, kernel_size))                  # (T, T)
    w_eff = ws + jnp.einsum("st,nto->nso", avg, wt - ws)                 # (N, T, O)
    b_eff = bs + bt                                                      # (N, 1, O)

    # ---- layout + padding -----------------------------------------------------------
    # (B,T,N,D) -> (B,N,D,T) -> flat rows -> (N, B*D, T); slab q == module's quirky slice.
    x3d = jnp.transpose(x, (0, 2, 3, 1)).reshape(N, BD, T)

    Op = _round_up(max(O, 1), 128)        # lane-dense output
    BDp = _round_up(BD, 8)                # sublane-aligned rows

    # ---- node blocking under a conservative VMEM budget ------------------------------
    cd_size = np.dtype(compute_dtype).itemsize
    per_node_bytes = (BDp * T + T * Op) * cd_size + (Op + BDp * Op) * 4  # x,w + b,out(f32)
    vmem_budget = 8 * 1024 * 1024         # double-buffered working set; safe on v5e/v6e/v7x
    nblk_vmem = max(1, vmem_budget // (2 * per_node_bytes))
    # keep >= 2 grid steps when N >= 2 so v7x's two TensorCores both get work
    nblk = int(max(1, min(nblk_vmem, -(-N // 2), N)))
    n_blocks = -(-N // nblk)
    Np = n_blocks * nblk

    x_p = jnp.pad(x3d, ((0, Np - N), (0, BDp - BD), (0, 0))).astype(compute_dtype)
    w_p = jnp.pad(w_eff, ((0, Np - N), (0, 0), (0, Op - O))).astype(compute_dtype)
    b_p = jnp.pad(b_eff, ((0, Np - N), (0, 0), (0, Op - O))).astype(jnp.float32)

    out_p = pl.pallas_call(
        _dlinear_fused_kernel,
        out_shape=jax.ShapeDtypeStruct((Np, BDp, Op), jnp.float32),
        grid_spec=pltpu.PrefetchScalarGridSpec(
            num_scalar_prefetch=0,
            grid=(n_blocks,),
            in_specs=[
                pl.BlockSpec((nblk, BDp, T), lambda i: (i, 0, 0)),   # x slabs
                pl.BlockSpec((nblk, T, Op), lambda i: (i, 0, 0)),    # folded weights
                pl.BlockSpec((nblk, 1, Op), lambda i: (i, 0, 0)),    # merged bias
            ],
            out_specs=pl.BlockSpec((nblk, BDp, Op), lambda i: (i, 0, 0)),
        ),
        compiler_params=pltpu.CompilerParams(
            dimension_semantics=("parallel",)),
    )(x_p, w_p, b_p)

    # ---- unpad + reproduce the module's stack/view/permute ---------------------------
    out_nbo = out_p[:N, :BD, :O]                     # (N, B*D, O)
    stacked = jnp.transpose(out_nbo, (1, 0, 2))      # == torch.stack(dim=1): (B*D, N, O)
    out = stacked.reshape(B, N, D, O)                # == .view(B, N, D, O)
    return jnp.transpose(out, (0, 3, 1, 2))          # == .permute(0, 3, 1, 2)


def dlinear_temporal_reference(x, ws, bs, wt, bt, kernel_size):
    """Pure-JAX transcription of the PyTorch forward (for verification)."""
    B, T, N, D = x.shape
    O = ws.shape[-1]
    x2d = jnp.transpose(x, (0, 2, 3, 1)).reshape(B * N * D, T)
    pad = (kernel_size - 1) // 2
    xp = jnp.concatenate(
        [jnp.repeat(x2d[:, :1], pad, axis=1), x2d,
         jnp.repeat(x2d[:, -1:], pad, axis=1)], axis=1)
    mean = jnp.stack([xp[:, t:t + kernel_size].mean(axis=1) for t in range(T)],
                     axis=1)
    res = x2d - mean
    outs = []
    for n in range(N):
        r = res[B * n * D:B * (n + 1) * D]
        m = mean[B * n * D:B * (n + 1) * D]
        outs.append(r @ ws[n] + bs[n, 0] + m @ wt[n] + bt[n, 0])
    stacked = jnp.stack(outs, axis=1)                # (B*D, N, O)
    return jnp.transpose(stacked.reshape(B, N, D, O), (0, 3, 1, 2))


if __name__ == "__main__":
    # small, module-consistent shapes
    B, T, N, D = 2, 12, 4, 4          # batch, in_steps, num_nodes, feature dim
    out_steps = 12
    kernel_size = 3                   # odd, as the torch module assumes

    key = jax.random.PRNGKey(0)
    kx, kws, kbs, kwt, kbt = jax.random.split(key, 5)

    x = jax.random.normal(kx, (B, T, N, D), dtype=jnp.float32)

    # per-node Linear(in_steps, out_steps): weights pre-transposed to (N, T, O),
    # biases as (N, 1, O)
    ws = jax.random.normal(kws, (N, T, out_steps), dtype=jnp.float32) * 0.1
    bs = jax.random.normal(kbs, (N, 1, out_steps), dtype=jnp.float32) * 0.1
    wt = jax.random.normal(kwt, (N, T, out_steps), dtype=jnp.float32) * 0.1
    bt = jax.random.normal(kbt, (N, 1, out_steps), dtype=jnp.float32) * 0.1

    ref = jax.block_until_ready(
        dlinear_temporal_reference(x, ws, bs, wt, bt, kernel_size))

    # f32 path (exact semantics; fold is algebraically identical)
    out_f32 = jax.block_until_ready(
        dlinear_temporal_pallas(x, ws, bs, wt, bt, kernel_size,
                                compute_dtype=jnp.float32))
    assert out_f32.shape == (B, out_steps, N, D), out_f32.shape
    np.testing.assert_allclose(np.asarray(out_f32), np.asarray(ref),
                               rtol=1e-3, atol=1e-3)

    # bf16 operand / f32 accumulation path (v6e/v7x MXU-friendly)
    out_bf16 = jax.block_until_ready(
        dlinear_temporal_pallas(x, ws, bs, wt, bt, kernel_size,
                                compute_dtype=jnp.bfloat16))
    np.testing.assert_allclose(np.asarray(out_bf16), np.asarray(ref),
                               rtol=5e-2, atol=5e-2)

    print("KERNEL_OK")
</pallas_src>

<mosaic_0001>
module attributes {stable_mosaic.version = 11 : i64} {
  func.func @_dlinear_fused_kernel(%arg0: i32, %arg1: memref<2x8x12xf32, #tpu.memory_space<vmem>>, %arg2: memref<2x12x128xf32, #tpu.memory_space<vmem>>, %arg3: memref<2x1x128xf32, #tpu.memory_space<vmem>>, %arg4: memref<2x8x128xf32, #tpu.memory_space<vmem>>) attributes {dimension_semantics = [#tpu.dimension_semantics<parallel>], iteration_bounds = array<i64: 2>, scalar_prefetch = 0 : i64, scratch_operands = 0 : i64, tpu.core_type = #tpu.core_type<tc>, window_params = [{transform_indices = @transform_0, window_bounds = array<i64: 2, 8, 12>}, {transform_indices = @transform_1, window_bounds = array<i64: 2, 12, 128>}, {transform_indices = @transform_2, window_bounds = array<i64: 2, 1, 128>}, {transform_indices = @transform_3, window_bounds = array<i64: 2, 8, 128>}]} {
    %c0 = arith.constant 0 : index
    %c0_0 = arith.constant 0 : index
    %c0_1 = arith.constant 0 : index
    %0 = vector.load %arg1[%c0, %c0_0, %c0_1] : memref<2x8x12xf32, #tpu.memory_space<vmem>>, vector<2x8x12xf32>
    %c0_2 = arith.constant 0 : index
    %c0_3 = arith.constant 0 : index
    %c0_4 = arith.constant 0 : index
    %1 = vector.load %arg2[%c0_2, %c0_3, %c0_4] : memref<2x12x128xf32, #tpu.memory_space<vmem>>, vector<2x12x128xf32>
    "tpu.trace_start"() <{level = 10 : i32, message = "nrt,nto->nro"}> : () -> ()
    %cst = arith.constant dense<0.000000e+00> : vector<2x8x128xf32>
    %2 = tpu.matmul %0, %1, %cst {dimension_numbers = #tpu.dot_dimension_numbers<[2], [1], [1], [2], [0, 0, 0, 1, 1, 2], [0], [0]>} : vector<2x8x12xf32>, vector<2x12x128xf32>, vector<2x8x128xf32> -> vector<2x8x128xf32>
    "tpu.trace_stop"() : () -> ()
    %c0_5 = arith.constant 0 : index
    %c0_6 = arith.constant 0 : index
    %c0_7 = arith.constant 0 : index
    %3 = vector.load %arg3[%c0_5, %c0_6, %c0_7] : memref<2x1x128xf32, #tpu.memory_space<vmem>>, vector<2x1x128xf32>
    %4 = vector.broadcast %3 : vector<2x1x128xf32> to vector<2x8x128xf32>
    %5 = arith.addf %2, %4 : vector<2x8x128xf32>
    %c0_8 = arith.constant 0 : index
    %c0_9 = arith.constant 0 : index
    %c0_10 = arith.constant 0 : index
    %6 = vector.load %arg4[%c0_8, %c0_9, %c0_10] : memref<2x8x128xf32, #tpu.memory_space<vmem>>, vector<2x8x128xf32>
    tpu.vector_store %arg4[%c0_8, %c0_9, %c0_10], %5 {strides = array<i32>} : memref<2x8x128xf32, #tpu.memory_space<vmem>>, vector<2x8x128xf32>,
    return
  }
  func.func @transform_0(%arg0: i32) -> (i32, i32, i32) {
    %c0_i32 = arith.constant 0 : i32
    %c0_i32_0 = arith.constant 0 : i32
    %c0_i32_1 = arith.constant 0 : i32
    return %arg0, %c0_i32, %c0_i32_0 : i32, i32, i32
  }
  func.func @transform_1(%arg0: i32) -> (i32, i32, i32) {
    %c0_i32 = arith.constant 0 : i32
    %c0_i32_0 = arith.constant 0 : i32
    %c0_i32_1 = arith.constant 0 : i32
    return %arg0, %c0_i32, %c0_i32_0 : i32, i32, i32
  }
  func.func @transform_2(%arg0: i32) -> (i32, i32, i32) {
    %c0_i32 = arith.constant 0 : i32
    %c0_i32_0 = arith.constant 0 : i32
    %c0_i32_1 = arith.constant 0 : i32
    return %arg0, %c0_i32, %c0_i32_0 : i32, i32, i32
  }
  func.func @transform_3(%arg0: i32) -> (i32, i32, i32) {
    %c0_i32 = arith.constant 0 : i32
    %c0_i32_0 = arith.constant 0 : i32
    %c0_i32_1 = arith.constant 0 : i32
    return %arg0, %c0_i32, %c0_i32_0 : i32, i32, i32
  }
}

</mosaic_0001>

<bundles_post_ra>
// kernel: tpu_custom_call.1
= control target key start
LH: loop header
LB: loop body
LE: loop exit
PB: predicated region body
PF: predicated region fallthrough
CT: control target
= control target key end

     0   :  { %8 = vsyncpa [#allocation3], 0  ;;  %s770_s0 = inlined_call_operand.vmem [shape: f32[4,8,12], index: 0, kind: input, shape index: {}]   ;;  %s771_s1 = inlined_call_operand.vmem [shape: f32[4,12,128], index: 1, kind: input, shape index: {}]   ;;  %s772_s2 = inlined_call_operand.vmem [shape: f32[4,1,128], index: 2, kind: input, shape index: {}]   ;;  %s773_s3 = inlined_call_operand.hbm [shape: f32[4,8,128], index: 3, kind: output, shape index: {}]  }
   0x1   :  { %10 = vsyncpa [#allocation3 + $0x1], 0  ;;  %s663_s12 = smov 0   ;;  %s665_s13 = smov 0  }
   0x2   :  { %s667_s14 = smov 0   ;;  %s669_s15 = smov 0  }
   0x3 LB: > { %s684_s16 = sadd.s32 4294967295, %s636_s15   ;;  %s489_s17 = sadd.s32 4294967294, %s636_s15   ;;  %s636_s15 = sphi %s669_s15, %s779_s15   ;;  %s632_s14 = sphi %s667_s14, %s778_s14   ;;  %s628_s13 = sphi %s665_s13, %s777_s13   ;;  %s624_s12 = sphi %s663_s12, %s776_s12  }
   0x4   : > { %s688_s18 = sadd.s32 1, %s636_s15   ;;  %s101_s19 = sadd.s32 1, %s632_s14 }
   0x5   : > { %s98_s20 = ssub.s32 %s636_s15, %s688_s18  ;;  %p111_p0 = scmp.ne.s32.totalorder %s632_s14, %s628_s13 }
   0x6   : > { %p99_p1 = scmp.eq.s32.totalorder %s98_s20, 0  ;;  %p112_p2 = scmp.eq.s32.totalorder %s684_s16, 1 }
   0x7   : > { %p117_p3 = scmp.ne.s32.totalorder %s628_s13, %s624_s12  ;;  %p118_p4 = scmp.eq.s32.totalorder %s489_s17, 1 }
   0x8   : > { %s699_s21 = scalar_select %p99_p1, %s632_s14, %s101_s19  }
   0x9   : > { %p701_p5 = por %p112_p2, %p111_p0  ;;  %p705_p6 = por %p118_p4, %p117_p3 }
   0xa   : > { %p492_p7 = scmp.ge.s32.totalorder %s636_s15, 1  ;;  %p163_p8 = scmp.lt.s32.totalorder %s636_s15, 3 }
   0xc   : > { %p164_p9 = pnand %p492_p7, %p163_p8 }
   0xd   : > { %s494_s24 = sshll.u32 (!%p164_p9), %s684_s16, 1  ;;  %s194_s6 = sand.u32 (!%p164_p9), 1, %s628_s13  }
   0xe   : > { %167 = sbr.rel (%p164_p9) target bundleno = 235 (0xeb), region = 32  ;;  %p198_p10 = scmp.lt.s32.totalorder (!%p164_p9), %s494_s24, 3 }
   0xf   : > { %s493_s7 = sshll.u32 (!%p164_p9), %s194_s6, 4  ;;  %s512_s19 = sshll.u32 (!%p164_p9), %s684_s16, 8 }
  0x10   : > { %s196_s11 = scalar_lea.vmem (!%p164_p9), [#allocation2], %s493_s7  ;;  %s730_s16 = scalar_lea.sflag (!%p164_p9), [#allocation3], %s194_s6 }
  0x11   : > { %s406_s17 = sshll.u32 (!%p164_p9), %s196_s11, 4  ;;  %s640_s27 = smov (!%p164_p9), [#allocation2]   ;;  %s723_s17 = int_to_ptr.vmem [resolvable:$true] %s406_s17 }
  0x12   : > { %s580_s28 = sshll.u32 (!%p164_p9), %s640_s27, 4  ;;  %s581_s28 = int_to_ptr.vmem [resolvable:$false] %s580_s28 }
  0x13   : > { %v638_v0 = vmov 0.0   ;;  %vm639_vm0 = vmmov 0   ;;  %s781_s24 = smov (!%p198_p10, %s494_s24), 3  ;;  %vm240_vm1 = vcmask 1043456   ;;  %vm236_vm2 = vcmask 97280   ;;  %p583_p0 = scmp.lt.s32.totalorder %s723_s17, %s581_s28 }
  0x14   : > { %519 = vmatprep.subr.mxu0 %v638_v0  ;;  %526 = vmatprep.subr.mxu1 %v638_v0  ;;  %s511_s25 = sshll.u32 %s781_s24, 4  ;;  %s495_s26 = sshll.u32 %s781_s24, 3 }
  0x15   : > { %523 = vmatprep.mubr.msk.f32.mxu0 %vm639_vm0, %v638_v0  ;;  %530 = vmatprep.mubr.msk.f32.mxu1 %vm639_vm0, %v638_v0  ;;  %s208_s29 = scalar_lea.vmem %s771_s1, %s511_s25  ;;  %s201_s5 = scalar_lea.vmem %s770_s0, %s495_s26 }
  0x16   : > { %v219_v1 = vld [vmem:[%s208_s29 + $0x8] sm:$0xf]  ;;  %v221_v2 = vld [vmem:[%s208_s29 + $0x18] sm:$0xf]  ;;  %v218_v3 = vld [vmem:[%s208_s29] sm:$0xff]  ;;  %s213_s10 = scalar_lea.vmem %s772_s2, %s781_s24  ;;  %s728_s26 = scalar_lea.hbm %s773_s3, %s512_s19 }
  0x17   : > { %520 = vmatpush3.msk.msra.mxu0 %vm240_vm1, %v219_v1  ;;  %527 = vmatpush3.msk.msra.mxu1 %vm240_vm1, %v221_v2  ;;  %v220_v4 = vld [vmem:[%s208_s29 + $0x10] sm:$0xff]  ;;  %v216_v5 = vld [vmem:[%s201_s5] sm:$0xff]  ;;  %v217_v6 = vld [vmem:[%s201_s5 + $0x8] sm:$0xff]  ;;  %s576_s24 = scalar_lea.vmem %s723_s17, 256  ;;  %s582_s29 = scalar_lea.vmem %s581_s28, 512 }
  0x18   : > { %521 = vmatprep.subr.mxu0 %v638_v0  ;;  %528 = vmatprep.subr.mxu1 %v638_v0  ;;  %v500_v7 = vld [vmem:[%s213_s10] ss:$0 sm:$0xff]  ;;  %v501_v8 = vld [vmem:[%s213_s10 + $0x1] ss:$0 sm:$0xff]  ;;  %p577_p11 = scmp.ne.s32.totalorder %s723_s17, %s576_s24  ;;  %p584_p1 = scmp.lt.s32.totalorder %s582_s29, %s576_s24 }
  0x19   : > { %522 = vmatpush3.msra.mxu0 %v218_v3  ;;  %529 = vmatpush3.msra.mxu1 %v220_v4 }
  0x1a   : > { %524 = vmatmul.mubr.msk.f32.vlgmr.msra.gmra.mxu0 %vm236_vm2, %v216_v5  ;;  %531 = vmatmul.mubr.msk.f32.vlgmr.msra.gmra.mxu1 %vm236_vm2, %v217_v6  ;;  %p578_p12 = pnand %p577_p11, %p701_p5  ;;  %p585_p2 = por %p584_p1, %p583_p0 }
  0x1c   : > { %p579_p13 = pneg %p578_p12 }
  0x1e   : > { %p586_p3 = pnand %p585_p2, %p579_p13 }
  0xda   : > { %v310_v9 = vpop.f32.mrf.mxu0  ;;  %v386_v10 = vpop.f32.mrf.mxu1 }
  0xdb   : > { %v311_v11 = vadd.f32 %v500_v7, %v310_v9  ;;  %v387_v12 = vadd.f32 %v501_v8, %v386_v10 }
  0xdc   : > { %v525_v13 = vpop.f32.mrf.mxu0  ;;  %v532_v14 = vpop.f32.mrf.mxu1 }
  0xdd   : > { %390 = vst [vmem:[%s196_s11] sm:$0xff] %v311_v11  ;;  %391 = vst [vmem:[%s196_s11 + $0x8] sm:$0xff] %v387_v12 }
  0xde   : > { %589 = shalt.err (!%p586_p3)
}
  0xdf   : > { %s590_s30 = scalar_lea.hbm %s728_s26, 256  ;;  %s594_s6 = scalar_lea.hbm %s773_s3, 512 }
  0xe0   : > { %p591_p4 = scmp.ne.s32.totalorder %s728_s26, %s590_s30  ;;  %p595_p9 = scmp.lt.s32.totalorder %s728_s26, %s773_s3 }
  0xe1   : > { %p596_p10 = scmp.lt.s32.totalorder %s594_s6, %s590_s30 }
  0xe2   : > { %p592_p7 = pnand %p591_p4, %p701_p5 }
  0xe3   : > { %p597_p11 = por %p596_p10, %p595_p9 }
  0xe4   : > { %p593_p8 = pneg %p592_p7 }
  0xe6   : > { %p598_p12 = pnand %p597_p11, %p593_p8 }
  0xe8   : > { %601 = shalt.err (!%p598_p12)
}
  0xe9   : > { %s641_s9 = smov 128   ;;  %s642_s10 = smov 8  }
  0xea   : > { %533 = dma.vmem_to_hbm [thread:$0]  (%p701_p5), %s723_s17, 256, %s728_s26, %s730_s16, %s641_s9, %s641_s9, %s642_s10  }
  0xeb PF: > { %p539_p13 = scmp.ge.s32.totalorder %s636_s15, 2  ;;  %s421_s11 = sand.u32 1, %s624_s12  }
  0xec   : > { %s422_s19 = scalar_lea.sflag [#allocation3], %s421_s11 }
  0xed   : > { %p536_p0 = pnand %p539_p13, %p705_p6 }
  0xef   : > { %p537_p1 = pneg %p536_p0 }
  0xf1   : > { %619 = dma.done.wait (%p537_p1), %s422_s19, 256  }
  0xf2   : > { %621 = vsyncadd (%p537_p1), %s422_s19, 4294967040  ;;  %p13_p2 = scmp.ge.s32.totalorder %s688_s18, 4   ;;  %s776_s12 = smov %s628_s13 }
  0xf3   : > { %s777_s13 = smov %s632_s14  ;;  %s778_s14 = smov %s699_s21 }
  0xf4   : > { %s779_s15 = smov %s688_s18  ;;  %15 = sbr.rel (!%p13_p2) target bundleno = 3 (0x3), region = 73 }
  0xf9   :  { %427 = vsyncpa [#allocation3], 1 }
  0xfa   :  { %429 = vsyncpa [#allocation3 + $0x1], 1 }

</bundles_post_ra>
